<compile_context>
chip_gen: v7x
topology: tpu7x:2x2x1
jax: 0.10.0
libtpu: 0.0.40
codegen_flags: <defaults>
</compile_context>

<pallas_src>
import math
import functools
import numpy as np
import jax
import jax.numpy as jnp
from jax import lax
from jax.experimental import pallas as pl
from jax.experimental.pallas import tpu as pltpu


# ----------------------------------------------------------------------------
# RoPE angle construction (plain JAX constant setup; analogue of the lazily
# registered buffers in the PyTorch module)
# ----------------------------------------------------------------------------
def get_rope_2d_angles(dim, grid_size, base=10000.0):
    """Axial 2D RoPE angles. Returns (cos, sin) each of shape (grid^2, dim)."""
    half = dim // 2          # rotary pairs (rotate-half pairing i <-> i + dim/2)
    quarter = half // 2      # pairs per spatial axis
    freqs = 1.0 / (base ** (jnp.arange(quarter, dtype=jnp.float32) / quarter))
    ys, xs = jnp.meshgrid(jnp.arange(grid_size, dtype=jnp.float32),
                          jnp.arange(grid_size, dtype=jnp.float32), indexing="ij")
    ys = ys.reshape(-1)
    xs = xs.reshape(-1)
    ang = jnp.concatenate([ys[:, None] * freqs[None, :],
                           xs[:, None] * freqs[None, :]], axis=-1)      # (N, dim/2)
    cos = jnp.concatenate([jnp.cos(ang), jnp.cos(ang)], axis=-1)        # (N, dim)
    sin = jnp.concatenate([jnp.sin(ang), jnp.sin(ang)], axis=-1)        # (N, dim)
    return cos, sin


# ----------------------------------------------------------------------------
# In-kernel helpers (values, not refs)
# ----------------------------------------------------------------------------
def _layer_norm(x, g, b, eps=1e-5):
    mu = jnp.mean(x, axis=-1, keepdims=True)
    var = jnp.mean((x - mu) ** 2, axis=-1, keepdims=True)
    return (x - mu) * lax.rsqrt(var + eps) * g + b


def _rope_signed(x, cos, sin_signed):
    # rotate-half as a single XLU lane rotation (shift = dim/2, so direction is
    # irrelevant); the "-" of the usual [-x2, x1] pairing is pre-folded into
    # sin_signed outside the kernel, so this is one roll + 2 FMA.
    x_rot = pltpu.roll(x, x.shape[-1] // 2, x.ndim - 1)
    return x * cos + x_rot * sin_signed


# ----------------------------------------------------------------------------
# Kernel 1: batch-independent query path (computed once, not per image)
#   qp = ln_q(queries) -> 2D-RoPE -> @ (w_in_q * scale) + (b_in_q * scale)
# Emitted as bf16 (it is only ever an MXU input downstream).
# ----------------------------------------------------------------------------
def _q_proj_kernel(q_ref, g_ref, b_ref, cos_ref, sin_ref, w_ref, bias_ref, o_ref):
    q = _layer_norm(q_ref[...].astype(jnp.float32), g_ref[...], b_ref[...])
    q = _rope_signed(q, cos_ref[...], sin_ref[...])
    o_ref[...] = (jnp.dot(q.astype(w_ref.dtype), w_ref[...],
                          preferred_element_type=jnp.float32)
                  + bias_ref[...]).astype(o_ref.dtype)


# ----------------------------------------------------------------------------
# Kernel 2: fused adapter, one grid step per batch element
# ----------------------------------------------------------------------------
def _adapter_kernel(num_heads,
                    x_ref, qp_ref, w_xk_ref, w_xv_ref, ln_g_ref, ln_b_ref,
                    kcos_ref, ksin_ref, w_in_k_ref, b_in_k_ref, b_in_v_ref,
                    w_out_po_ref, b_out_po_ref,
                    o_ref,
                    attn_ref):
    E = ln_g_ref.shape[-1]
    dh = E // num_heads
    mxu_dtype = w_xk_ref.dtype            # bf16 weights -> bf16 MXU inputs

    x = x_ref[0]                                                      # bf16 (Nk, E)

    # ---- keys projection + fused values path ---------------------------------
    # values in-projection is algebraically folded into w_xv = w_pv @ w_in_v,
    # so kv needs only two (Nk, E) GEMMs instead of three.
    keys_pre = jnp.dot(x, w_xk_ref[...], preferred_element_type=jnp.float32)
    vp = jnp.dot(x, w_xv_ref[...],
                 preferred_element_type=jnp.float32) + b_in_v_ref[...]   # (Nk, E)

    # ---- ln_kv + 2D-RoPE on keys (f32 elementwise) ----------------------------
    keys = _layer_norm(keys_pre, ln_g_ref[...], ln_b_ref[...])
    keys = _rope_signed(keys, kcos_ref[...], ksin_ref[...])

    # ---- key in-projection -----------------------------------------------------
    kp = jnp.dot(keys.astype(mxu_dtype), w_in_k_ref[...],
                 preferred_element_type=jnp.float32) + b_in_k_ref[...]   # (Nk, E)

    qp = qp_ref[...]                       # bf16 (Nq, E); softmax scale pre-folded
    kp_b = kp.astype(mxu_dtype)
    vp_b = vp.astype(mxu_dtype)

    # ---- per-head scaled-dot-product attention (static unroll) ----------------
    # Scores via NT dot_general (contracts on head_dim, no kh.T materialization);
    # per-head outputs land in the f32 VMEM scratch at static lane offsets so
    # only one head's tiles are live at a time.
    for h in range(num_heads):
        sl = slice(h * dh, (h + 1) * dh)
        s = lax.dot_general(qp[:, sl], kp_b[:, sl],
                            (((1,), (1,)), ((), ())),
                            preferred_element_type=jnp.float32)          # (Nq, Nk)
        m = jnp.max(s, axis=-1, keepdims=True)
        p = jnp.exp(s - m)
        inv_l = pl.reciprocal(jnp.sum(p, axis=-1, keepdims=True), approx=True)
        attn_ref[:, sl] = jnp.dot(p.astype(mxu_dtype), vp_b[:, sl],
                                  preferred_element_type=jnp.float32) * inv_l

    # ---- fused tail: (attn @ w_out + b_out) @ w_po == attn @ w_out_po + b_out_po
    attn = attn_ref[...].astype(mxu_dtype)
    o_ref[0] = (jnp.dot(attn, w_out_po_ref[...],
                        preferred_element_type=jnp.float32)
                + b_out_po_ref[...]).astype(o_ref.dtype)


# ----------------------------------------------------------------------------
# Forward wrapper (glue around the two Pallas calls)
# ----------------------------------------------------------------------------
def position_aware_adapter_forward(vision_features, params, num_heads):
    x = vision_features
    B, Nk, E = x.shape
    Nq = params["queries"].shape[0]
    lang_dim = params["w_proj_out"].shape[1]
    f32 = jnp.float32
    mxu_dtype = jnp.bfloat16   # MXU inputs; accumulation stays f32
    dh = E // num_heads
    scale = 1.0 / math.sqrt(dh)

    # RoPE tables (assumes square token / query grids, as the module does)
    # TODO(synk): non-square grids silently get wrong angles -- same as module.
    q_cos, q_sin = get_rope_2d_angles(E, int(round(math.sqrt(Nq))))
    if Nk != Nq:
        k_cos, k_sin = get_rope_2d_angles(E, int(round(math.sqrt(Nk))))
    else:
        k_cos, k_sin = q_cos, q_sin

    # Fold the rotate-half sign into sin so kernels only do roll + mul/add.
    half = E // 2
    sign = jnp.concatenate([-jnp.ones((1, half), f32),
                            jnp.ones((1, half), f32)], axis=-1)
    q_sin_s = q_sin * sign
    k_sin_s = k_sin * sign

    # --- exact algebraic fusions, done once in f32, then cast bf16 for the MXU
    w_xk = params["w_proj_keys"].astype(mxu_dtype)                         # (E, E)
    w_xv = (params["w_proj_values"] @ params["w_in_v"]).astype(mxu_dtype)  # (E, E)
    w_in_k = params["w_in_k"].astype(mxu_dtype)
    w_in_q = (params["w_in_q"] * scale).astype(mxu_dtype)   # softmax scale folded
    b_in_q = params["b_in_q"] * scale                        # (f32)
    w_out_po = (params["w_out_proj"] @ params["w_proj_out"]).astype(mxu_dtype)
    b_out_po = params["b_out_proj"] @ params["w_proj_out"]   # (1, lang_dim) f32

    # x is only ever an MXU input -> bf16 halves the per-grid-step DMA.
    x_b = x.astype(mxu_dtype)

    # (1) queries path, computed exactly once (batch independent)
    qp = pl.pallas_call(
        _q_proj_kernel,
        out_shape=jax.ShapeDtypeStruct((Nq, E), mxu_dtype),
    )(params["queries"], params["ln_q_g"], params["ln_q_b"],
      q_cos, q_sin_s, w_in_q, b_in_q)

    # (2) fused adapter: one grid step per image; all weights + cos/sin + qp
    #     reuse the same VMEM block across the batch (constant index_maps).
    kernel = functools.partial(_adapter_kernel, num_heads)
    out = pl.pallas_call(
        kernel,
        out_shape=jax.ShapeDtypeStruct((B, Nq, lang_dim), f32),
        grid=(B,),
        in_specs=[
            pl.BlockSpec((1, Nk, E), lambda b: (b, 0, 0)),        # x (bf16)
            pl.BlockSpec((Nq, E), lambda b: (0, 0)),              # qp (bf16, scaled)
            pl.BlockSpec((E, E), lambda b: (0, 0)),               # w_proj_keys
            pl.BlockSpec((E, E), lambda b: (0, 0)),               # w_pv @ w_in_v
            pl.BlockSpec((1, E), lambda b: (0, 0)),               # ln_kv gamma
            pl.BlockSpec((1, E), lambda b: (0, 0)),               # ln_kv beta
            pl.BlockSpec((Nk, E), lambda b: (0, 0)),              # k_cos
            pl.BlockSpec((Nk, E), lambda b: (0, 0)),              # k_sin (signed)
            pl.BlockSpec((E, E), lambda b: (0, 0)),               # w_in_k
            pl.BlockSpec((1, E), lambda b: (0, 0)),               # b_in_k
            pl.BlockSpec((1, E), lambda b: (0, 0)),               # b_in_v
            pl.BlockSpec((E, lang_dim), lambda b: (0, 0)),        # w_out @ w_po
            pl.BlockSpec((1, lang_dim), lambda b: (0, 0)),        # b_out @ w_po
        ],
        out_specs=pl.BlockSpec((1, Nq, lang_dim), lambda b: (b, 0, 0)),
        scratch_shapes=[pltpu.VMEM((Nq, E), jnp.float32)],        # per-head attn out
        compiler_params=pltpu.CompilerParams(
            dimension_semantics=("parallel",),                    # v7x: 2 TCs
            vmem_limit_bytes=48 * 1024 * 1024),
    )(x_b, qp, w_xk, w_xv, params["ln_kv_g"], params["ln_kv_b"],
      k_cos, k_sin_s, w_in_k, params["b_in_k"], params["b_in_v"],
      w_out_po, b_out_po)
    return out


# ----------------------------------------------------------------------------
# Pure-JAX reference (original, unfused module math) for verification
# ----------------------------------------------------------------------------
def reference_forward(x, params, num_heads):
    def ln(v, g, b):
        mu = jnp.mean(v, -1, keepdims=True)
        var = jnp.mean((v - mu) ** 2, -1, keepdims=True)
        return (v - mu) * lax.rsqrt(var + 1e-5) * g + b

    def rope(v, cos, sin):
        h = v.shape[-1] // 2
        vr = jnp.concatenate([-v[..., h:], v[..., :h]], -1)
        return v * cos + vr * sin

    B, Nk, E = x.shape
    Nq = params["queries"].shape[0]
    dh = E // num_heads
    q_cos, q_sin = get_rope_2d_angles(E, int(round(math.sqrt(Nq))))
    k_cos, k_sin = (q_cos, q_sin) if Nk == Nq else get_rope_2d_angles(E, int(round(math.sqrt(Nk))))

    keys = rope(ln(x @ params["w_proj_keys"], params["ln_kv_g"], params["ln_kv_b"]), k_cos, k_sin)
    q = rope(ln(params["queries"], params["ln_q_g"], params["ln_q_b"]), q_cos, q_sin)
    q = jnp.tile(q[None], (B, 1, 1))
    values = x @ params["w_proj_values"]

    qp = q @ params["w_in_q"] + params["b_in_q"]
    kp = keys @ params["w_in_k"] + params["b_in_k"]
    vp = values @ params["w_in_v"] + params["b_in_v"]

    qh = qp.reshape(B, Nq, num_heads, dh).transpose(0, 2, 1, 3)
    kh = kp.reshape(B, Nk, num_heads, dh).transpose(0, 2, 1, 3)
    vh = vp.reshape(B, Nk, num_heads, dh).transpose(0, 2, 1, 3)

    s = jnp.einsum("bhqd,bhkd->bhqk", qh, kh) / math.sqrt(dh)
    p = jax.nn.softmax(s, axis=-1)
    o = jnp.einsum("bhqk,bhkd->bhqd", p, vh).transpose(0, 2, 1, 3).reshape(B, Nq, E)
    o = o @ params["w_out_proj"] + params["b_out_proj"]
    return o @ params["w_proj_out"]


# ----------------------------------------------------------------------------
# Main
# ----------------------------------------------------------------------------
if __name__ == "__main__":
    # Small, module-consistent, lane-aligned shapes (E multiple of 128 so the
    # RoPE lane roll and head slicing are clean, as at production E=1152).
    B = 2
    vision_dim = 128     # embed dim (E)
    lang_dim = 64
    num_queries = 16     # 4x4 query grid
    num_heads = 4        # head_dim = 32
    vision_tokens = 16   # 4x4 key grid

    key = jax.random.PRNGKey(0)
    ks = jax.random.split(key, 16)
    std = 0.02
    E = vision_dim

    # Deterministic synthetic parameters (weights stored pre-transposed: (in, out))
    params = {
        "queries":       std * jax.random.normal(ks[0], (num_queries, E), jnp.float32),
        "w_proj_keys":   std * jax.random.normal(ks[1], (E, E), jnp.float32),
        "w_proj_values": std * jax.random.normal(ks[2], (E, E), jnp.float32),
        "ln_q_g":  1.0 + std * jax.random.normal(ks[3], (1, E), jnp.float32),
        "ln_q_b":        std * jax.random.normal(ks[4], (1, E), jnp.float32),
        "ln_kv_g": 1.0 + std * jax.random.normal(ks[5], (1, E), jnp.float32),
        "ln_kv_b":       std * jax.random.normal(ks[6], (1, E), jnp.float32),
        # MultiheadAttention in_proj (q/k/v) + out_proj
        "w_in_q": std * jax.random.normal(ks[7], (E, E), jnp.float32),
        "w_in_k": std * jax.random.normal(ks[8], (E, E), jnp.float32),
        "w_in_v": std * jax.random.normal(ks[9], (E, E), jnp.float32),
        "b_in_q": std * jax.random.normal(ks[10], (1, E), jnp.float32),
        "b_in_k": std * jax.random.normal(ks[11], (1, E), jnp.float32),
        "b_in_v": std * jax.random.normal(ks[12], (1, E), jnp.float32),
        "w_out_proj": std * jax.random.normal(ks[13], (E, E), jnp.float32),
        "b_out_proj": std * jax.random.normal(ks[14], (1, E), jnp.float32),
        "w_proj_out": std * jax.random.normal(ks[15], (E, lang_dim), jnp.float32),
    }

    x = jax.random.normal(jax.random.PRNGKey(1), (B, vision_tokens, vision_dim), jnp.float32)

    out = position_aware_adapter_forward(x, params, num_heads)
    out = jax.block_until_ready(out)
    assert out.shape == (B, num_queries, lang_dim), out.shape

    ref = jax.block_until_ready(reference_forward(x, params, num_heads))
    np.testing.assert_allclose(np.asarray(out), np.asarray(ref), rtol=1e-2, atol=1e-3)

    print("KERNEL_OK")
</pallas_src>

<mosaic_0001>
module attributes {stable_mosaic.version = 11 : i64} {
  func.func @_q_proj_kernel(%arg0: memref<16x128xf32, #tpu.memory_space<vmem>>, %arg1: memref<1x128xf32, #tpu.memory_space<vmem>>, %arg2: memref<1x128xf32, #tpu.memory_space<vmem>>, %arg3: memref<16x128xf32, #tpu.memory_space<vmem>>, %arg4: memref<16x128xf32, #tpu.memory_space<vmem>>, %arg5: memref<128x128xbf16, #tpu.memory_space<vmem>>, %arg6: memref<1x128xf32, #tpu.memory_space<vmem>>, %arg7: memref<16x128xbf16, #tpu.memory_space<vmem>>) attributes {dimension_semantics = [], scalar_prefetch = 0 : i64, scratch_operands = 0 : i64, tpu.core_type = #tpu.core_type<tc>} {
    %c0 = arith.constant 0 : index
    %c0_0 = arith.constant 0 : index
    %0 = vector.load %arg0[%c0, %c0_0] : memref<16x128xf32, #tpu.memory_space<vmem>>, vector<16x128xf32>
    %c0_1 = arith.constant 0 : index
    %c0_2 = arith.constant 0 : index
    %1 = vector.load %arg1[%c0_1, %c0_2] : memref<1x128xf32, #tpu.memory_space<vmem>>, vector<1x128xf32>
    %c0_3 = arith.constant 0 : index
    %c0_4 = arith.constant 0 : index
    %2 = vector.load %arg2[%c0_3, %c0_4] : memref<1x128xf32, #tpu.memory_space<vmem>>, vector<1x128xf32>
    %cst = arith.constant dense<0.000000e+00> : vector<16xf32>
    %3 = vector.multi_reduction <add>, %0, %cst [1] : vector<16x128xf32> to vector<16xf32>
    %4 = vector.shape_cast %3 : vector<16xf32> to vector<16x1xf32>
    %cst_5 = arith.constant 1.280000e+02 : f32
    %5 = vector.broadcast %cst_5 : f32 to vector<16x1xf32>
    %6 = arith.divf %4, %5 : vector<16x1xf32>
    %7 = vector.broadcast %6 : vector<16x1xf32> to vector<16x128xf32>
    %8 = arith.subf %0, %7 : vector<16x128xf32>
    %9 = arith.mulf %8, %8 : vector<16x128xf32>
    %cst_6 = arith.constant dense<0.000000e+00> : vector<16xf32>
    %10 = vector.multi_reduction <add>, %9, %cst_6 [1] : vector<16x128xf32> to vector<16xf32>
    %11 = vector.shape_cast %10 : vector<16xf32> to vector<16x1xf32>
    %cst_7 = arith.constant 1.280000e+02 : f32
    %12 = vector.broadcast %cst_7 : f32 to vector<16x1xf32>
    %13 = arith.divf %11, %12 : vector<16x1xf32>
    %14 = vector.broadcast %6 : vector<16x1xf32> to vector<16x128xf32>
    %15 = arith.subf %0, %14 : vector<16x128xf32>
    %cst_8 = arith.constant 9.99999974E-6 : f32
    %16 = vector.broadcast %cst_8 : f32 to vector<16x1xf32>
    %17 = arith.addf %13, %16 : vector<16x1xf32>
    %18 = math.rsqrt %17 : vector<16x1xf32>
    %19 = vector.broadcast %18 : vector<16x1xf32> to vector<16x128xf32>
    %20 = arith.mulf %15, %19 : vector<16x128xf32>
    %21 = vector.broadcast %1 : vector<1x128xf32> to vector<16x128xf32>
    %22 = arith.mulf %20, %21 : vector<16x128xf32>
    %23 = vector.broadcast %2 : vector<1x128xf32> to vector<16x128xf32>
    %24 = arith.addf %22, %23 : vector<16x128xf32>
    %c0_9 = arith.constant 0 : index
    %c0_10 = arith.constant 0 : index
    %25 = vector.load %arg3[%c0_9, %c0_10] : memref<16x128xf32, #tpu.memory_space<vmem>>, vector<16x128xf32>
    %c0_11 = arith.constant 0 : index
    %c0_12 = arith.constant 0 : index
    %26 = vector.load %arg4[%c0_11, %c0_12] : memref<16x128xf32, #tpu.memory_space<vmem>>, vector<16x128xf32>
    %c64_i32 = arith.constant 64 : i32
    %27 = tpu.dynamic_rotate %24 by %c64_i32 dim 1 : vector<16x128xf32>, i32 -> vector<16x128xf32>
    %28 = arith.mulf %24, %25 : vector<16x128xf32>
    %29 = arith.mulf %27, %26 : vector<16x128xf32>
    %30 = arith.addf %28, %29 : vector<16x128xf32>
    %31 = arith.truncf %30 : vector<16x128xf32> to vector<16x128xbf16>
    %c0_13 = arith.constant 0 : index
    %c0_14 = arith.constant 0 : index
    %32 = vector.load %arg5[%c0_13, %c0_14] : memref<128x128xbf16, #tpu.memory_space<vmem>>, vector<128x128xbf16>
    %cst_15 = arith.constant dense<0.000000e+00> : vector<16x128xf32>
    %33 = tpu.matmul %31, %32, %cst_15 {dimension_numbers = #tpu.dot_dimension_numbers<[1], [0], [0], [1], [0, 0, 1, 1], [], []>} : vector<16x128xbf16>, vector<128x128xbf16>, vector<16x128xf32> -> vector<16x128xf32>
    %c0_16 = arith.constant 0 : index
    %c0_17 = arith.constant 0 : index
    %34 = vector.load %arg6[%c0_16, %c0_17] : memref<1x128xf32, #tpu.memory_space<vmem>>, vector<1x128xf32>
    %35 = vector.broadcast %34 : vector<1x128xf32> to vector<16x128xf32>
    %36 = arith.addf %33, %35 : vector<16x128xf32>
    %37 = arith.truncf %36 : vector<16x128xf32> to vector<16x128xbf16>
    %c0_18 = arith.constant 0 : index
    %c0_19 = arith.constant 0 : index
    %38 = vector.load %arg7[%c0_18, %c0_19] : memref<16x128xbf16, #tpu.memory_space<vmem>>, vector<16x128xbf16>
    tpu.vector_store %arg7[%c0_18, %c0_19], %37 {strides = array<i32>} : memref<16x128xbf16, #tpu.memory_space<vmem>>, vector<16x128xbf16>,
    return
  }
}

</mosaic_0001>

<bundles_post_ra>
// kernel: tpu_custom_call.1
= control target key start
LH: loop header
LB: loop body
LE: loop exit
PB: predicated region body
PF: predicated region fallthrough
CT: control target
= control target key end

     0   :  { %12 = vsyncpa [#allocation3], 0  ;;  %s623_s0 = inlined_call_operand.hbm [shape: f32[16,128], index: 0, kind: input, shape index: {}]   ;;  %s624_s1 = inlined_call_operand.vmem [shape: f32[1,128], index: 1, kind: input, shape index: {}]   ;;  %s625_s2 = inlined_call_operand.vmem [shape: f32[1,128], index: 2, kind: input, shape index: {}]   ;;  %s626_s3 = inlined_call_operand.hbm [shape: f32[16,128], index: 3, kind: input, shape index: {}]   ;;  %s627_s4 = inlined_call_operand.hbm [shape: f32[16,128], index: 4, kind: input, shape index: {}]   ;;  %s628_s5 = inlined_call_operand.hbm [shape: bf16[128,128], index: 5, kind: input, shape index: {}]   ;;  %s629_s6 = inlined_call_operand.vmem [shape: f32[1,128], index: 6, kind: input, shape index: {}]   ;;  %s630_s7 = inlined_call_operand.hbm [shape: bf16[16,128], index: 7, kind: output, shape index: {}]  }
   0x1   :  { %13 = vsyncpa [#allocation6], 0 }
   0x2   :  { %14 = vsyncpa [#allocation9], 0 }
   0x3   :  { %15 = vsyncpa [#allocation4], 0  ;;  %s472_s24 = smov [#allocation5]   ;;  %s473_s26 = smov [#allocation2]  }
   0x4   :  { %s37_s25 = sshll.u32 %s472_s24, 4  ;;  %s21_s27 = sshll.u32 %s473_s26, 4  ;;  %s38_s25 = int_to_ptr.vmem [resolvable:$true] %s37_s25  ;;  %s523_s27 = int_to_ptr.vmem [resolvable:$true] %s21_s27 }
   0x5   :  { %s354_s30 = scalar_lea.hbm %s626_s3, 256 }
   0x6   :  { %p355_p0 = scmp.ne.s32.totalorder %s626_s3, %s354_s30  ;;  %p358_p1 = scmp.lt.u32.totalorder %s354_s30, %s626_s3 }
   0x8   :  { %p360_p2 = pnand %p358_p1, %p355_p0 }
   0xa   :  { %363 = shalt.err (!%p360_p2)
}
   0xb   :  { %s364_s12 = scalar_lea.vmem %s38_s25, 256  ;;  %p369_p4 = scmp.lt.s32.totalorder %s38_s25, %s38_s25 }
   0xc   :  { %p365_p3 = scmp.ne.s32.totalorder %s38_s25, %s364_s12  ;;  %p370_p5 = scmp.lt.s32.totalorder %s364_s12, %s364_s12 }
   0xe   :  { %p371_p6 = por %p370_p5, %p369_p4 }
  0x10   :  { %p372_p7 = pnand %p371_p6, %p365_p3 }
  0x12   :  { %375 = shalt.err (!%p372_p7)
}
  0x13   :  { %s474_s13 = smov 128   ;;  %s475_s14 = smov 8  }
  0x14   :  { %43 = dma.hbm_to_vmem [thread:$0]  %s626_s3, 256, %s38_s25, [#allocation6], %s474_s13, %s474_s13, %s475_s14  }
  0x15   :  { %s376_s19 = scalar_lea.hbm %s623_s0, 256 }
  0x16   :  { %p377_p8 = scmp.ne.s32.totalorder %s623_s0, %s376_s19  ;;  %p380_p9 = scmp.lt.u32.totalorder %s376_s19, %s623_s0 }
  0x18   :  { %p382_p10 = pnand %p380_p9, %p377_p8 }
  0x1a   :  { %385 = shalt.err (!%p382_p10)
}
  0x1b   :  { %s386_s24 = scalar_lea.vmem %s523_s27, 256  ;;  %p391_p12 = scmp.lt.s32.totalorder %s523_s27, %s523_s27 }
  0x1c   :  { %p387_p11 = scmp.ne.s32.totalorder %s523_s27, %s386_s24  ;;  %p392_p13 = scmp.lt.s32.totalorder %s386_s24, %s386_s24 }
  0x1e   :  { %p393_p0 = por %p392_p13, %p391_p12 }
  0x20   :  { %p394_p1 = pnand %p393_p0, %p387_p11 }
  0x22   :  { %397 = shalt.err (!%p394_p1)
}
  0x23   :  { %27 = dma.hbm_to_vmem [thread:$0]  %s623_s0, 256, %s523_s27, [#allocation3], %s474_s13, %s474_s13, %s475_s14  }
  0x24   :  { %s476_s26 = smov [#allocation7]   ;;  %s477_s29 = smov [#allocation8]  }
  0x25   :  { %s49_s28 = sshll.u32 %s476_s26, 4  ;;  %s61_s30 = sshll.u32 %s477_s29, 4  ;;  %s50_s28 = int_to_ptr.vmem [resolvable:$true] %s49_s28  ;;  %s560_s30 = int_to_ptr.vmem [resolvable:$true] %s61_s30 }
  0x26   :  { %s398_s10 = scalar_lea.hbm %s627_s4, 256 }
  0x27   :  { %p399_p2 = scmp.ne.s32.totalorder %s627_s4, %s398_s10  ;;  %p402_p3 = scmp.lt.u32.totalorder %s398_s10, %s627_s4 }
  0x29   :  { %p404_p4 = pnand %p402_p3, %p399_p2 }
  0x2b   :  { %407 = shalt.err (!%p404_p4)
}
  0x2c   :  { %s408_s0 = scalar_lea.vmem %s50_s28, 256  ;;  %p413_p6 = scmp.lt.s32.totalorder %s50_s28, %s50_s28 }
  0x2d   :  { %p409_p5 = scmp.ne.s32.totalorder %s50_s28, %s408_s0  ;;  %p414_p7 = scmp.lt.s32.totalorder %s408_s0, %s408_s0 }
  0x2f   :  { %p415_p8 = por %p414_p7, %p413_p6 }
  0x31   :  { %p416_p9 = pnand %p415_p8, %p409_p5 }
  0x33   :  { %419 = shalt.err (!%p416_p9)
}
  0x34   :  { %55 = dma.hbm_to_vmem [thread:$0]  %s627_s4, 256, %s50_s28, [#allocation6], %s474_s13, %s474_s13, %s475_s14  }
  0x35   :  { %s420_s20 = scalar_lea.hbm %s628_s5, 1024 }
  0x36   :  { %p421_p10 = scmp.ne.s32.totalorder %s628_s5, %s420_s20  ;;  %p424_p11 = scmp.lt.u32.totalorder %s420_s20, %s628_s5 }
  0x38   :  { %p426_p12 = pnand %p424_p11, %p421_p10 }
  0x3a   :  { %429 = shalt.err (!%p426_p12)
}
  0x3b   :  { %s430_s3 = scalar_lea.vmem %s560_s30, 1024  ;;  %p435_p0 = scmp.lt.s32.totalorder %s560_s30, %s560_s30 }
  0x3c   :  { %p431_p13 = scmp.ne.s32.totalorder %s560_s30, %s430_s3  ;;  %p436_p1 = scmp.lt.s32.totalorder %s430_s3, %s430_s3 }
  0x3e   :  { %p437_p2 = por %p436_p1, %p435_p0 }
  0x40   :  { %p438_p3 = pnand %p437_p2, %p431_p13 }
  0x42   :  { %441 = shalt.err (!%p438_p3)
}
  0x43   :  { %s478_s4 = smov 64   ;;  %s479_s13 = smov 4  }
  0x44   :  { %67 = dma.hbm_to_vmem [thread:$0]  %s628_s5, 1024, %s560_s30, [#allocation9], %s478_s4, %s478_s4, %s479_s13  }
  0x45   :  { %464 = dma.done.wait [#allocation3], 256  }
  0x46   :  { %465 = vsyncadd [#allocation3], 4294967040 }
  0x47   :  { %466 = dma.done.wait [#allocation6], 512  }
  0x48   :  { %467 = vsyncadd [#allocation6], 4294966784 }
  0x49   :  { %468 = dma.done.wait [#allocation9], 1024  }
  0x4a   :  { %469 = vsyncadd [#allocation9], 4294966272  ;;  %v83_v0 = vld [vmem:[#allocation2] sm:$0xff]  ;;  %v84_v1 = vld [vmem:[#allocation2 + $0x8] sm:$0xff]  ;;  %v480_v11 = vmov 0.0   ;;  %vm481_vm0 = vmmov 0  }
  0x4b   :  { %87 = vadd.xlane.f32.xlu0 %v83_v0  ;;  %v342_v10 = vld [vmem:[#allocation8] sm:$0xff]   ;;  %311 = vmatprep.subr.bf16.mxu0 %v480_v11  ;;  %v343_v12 = vld [vmem:[#allocation8 + $0x8] sm:$0xff]   ;;  %v344_v13 = vld [vmem:[#allocation8 + $0x10] sm:$0xff]   ;;  %s482_s30 = smov [#allocation10]  }
  0x4c   :  { %312 = vmatpush3.bf16.msra.mxu0 %v342_v10  ;;  %v345_v14 = vld [vmem:[#allocation8 + $0x18] sm:$0xff]   ;;  %v346_v15 = vld [vmem:[#allocation8 + $0x20] sm:$0xff]   ;;  %v347_v16 = vld [vmem:[#allocation8 + $0x28] sm:$0xff]   ;;  %327 = vmatprep.mubr.msk.bf16.mxu0 %vm481_vm0, %v480_v11  ;;  %s268_s8 = sshll.u32 %s482_s30, 4  ;;  %s269_s8 = int_to_ptr.vmem [resolvable:$true] %s268_s8 }
  0x4d   :  { %313 = vmatprep.subr.bf16.mxu0 %v480_v11  ;;  %v348_v23 = vld [vmem:[#allocation8 + $0x30] sm:$0xff]   ;;  %v349_v24 = vld [vmem:[#allocation8 + $0x38] sm:$0xff]   ;;  %v126_v37 = vld [vmem:[#allocation5] sm:$0xff]  ;;  %s442_s9 = scalar_lea.vmem %s269_s8, 128  ;;  %p447_p5 = scmp.lt.s32.totalorder %s269_s8, %s269_s8 }
  0x4e   :  { %v282_v26 = vld [vmem:[%s624_s1] ss:$0 sm:$0xff]  ;;  %v127_v38 = vld [vmem:[#allocation5 + $0x8] sm:$0xff]  ;;  %v129_v39 = vld [vmem:[#allocation7 + $0x8] sm:$0xff]  ;;  %p443_p4 = scmp.ne.s32.totalorder %s269_s8, %s442_s9  ;;  %p448_p6 = scmp.lt.s32.totalorder %s442_s9, %s442_s9 }
  0x4f   :  { %89 = vadd.xlane.f32.xlu0 %v84_v1  ;;  %v283_v28 = vld [vmem:[%s625_s2] ss:$0 sm:$0xff] }
  0x50   :  { %314 = vmatpush3.bf16.msra.mxu0 %v343_v12  ;;  %v128_v35 = vld [vmem:[#allocation7] sm:$0xff]  ;;  %p449_p7 = por %p448_p6, %p447_p5 }
  0x51   :  { %315 = vmatprep.subr.bf16.mxu0 %v480_v11  ;;  %v284_v48 = vld [vmem:[%s629_s6] ss:$0 sm:$0xff] }
  0x52   :  { %p450_p8 = pnand %p449_p7, %p443_p4 }
  0x54   :  { %316 = vmatpush3.bf16.msra.mxu0 %v344_v13 }
  0x55   :  { %317 = vmatprep.subr.bf16.mxu0 %v480_v11 }
  0x58   :  { %318 = vmatpush3.bf16.msra.mxu0 %v345_v14 }
  0x59   :  { %319 = vmatprep.subr.bf16.mxu0 %v480_v11 }
  0x5c   :  { %320 = vmatpush3.bf16.msra.mxu0 %v346_v15 }
  0x5d   :  { %321 = vmatprep.subr.bf16.mxu0 %v480_v11 }
  0x60   :  { %322 = vmatpush3.bf16.msra.mxu0 %v347_v16 }
  0x61   :  { %323 = vmatprep.subr.bf16.mxu0 %v480_v11 }
  0x64   :  { %324 = vmatpush3.bf16.msra.mxu0 %v348_v23 }
  0x65   :  { %325 = vmatprep.subr.bf16.mxu0 %v480_v11 }
  0x68   :  { %326 = vmatpush3.bf16.msra.mxu0 %v349_v24 }
  0xd8   :  { %v88_v2 = vpop.xlane.xlu0 %87 }
  0xd9   :  { %v92_v3 = vmul.f32 0.0078125, %v88_v2 }
  0xdb   :  { %v94_v4 = vsub.f32 %v83_v0, %v92_v3 }
  0xdc   :  { %v90_v5 = vpop.xlane.xlu0 %89 }
  0xdd   :  { %v93_v6 = vmul.f32 0.0078125, %v90_v5  ;;  %v96_v7 = vmul.f32 %v94_v4, %v94_v4 }
  0xdf   :  { %v95_v8 = vsub.f32 %v84_v1, %v93_v6  ;;  %98 = vadd.xlane.f32.xlu1 %v96_v7 }
  0xe1   :  { %v97_v9 = vmul.f32 %v95_v8, %v95_v8 }
  0xe3   :  { %100 = vadd.xlane.f32.xlu1 %v97_v9 }
 0x16c   :  { %v99_v17 = vpop.xlane.xlu1 %98 }
 0x16d   :  { %v102_v18 = vmul.f32 0.0078125, %v99_v17 }
 0x16f   :  { %v104_v19 = vadd.f32 1e-05, %v102_v18 }
 0x170   :  { %v101_v20 = vpop.xlane.xlu1 %100 }
 0x171   :  { %350 = vrsqrt.f32 %v104_v19  ;;  %v103_v21 = vmul.f32 0.0078125, %v101_v20 }
 0x173   :  { %v105_v22 = vadd.f32 1e-05, %v103_v21 }
 0x175   :  { %352 = vrsqrt.f32 %v105_v22 }
 0x17b   :  { %v351_v25 = vpop.eup %350 }
 0x17c   :  { %v108_v27 = vmul.f32 %v351_v25, %v94_v4 }
 0x17e   :  { %v116_v29 = vmul.f32 %v282_v26, %v108_v27 }
 0x17f   :  { %v353_v30 = vpop.eup %352 }
 0x180   :  { %v124_v31 = vadd.f32 %v283_v28, %v116_v29  ;;  %v109_v32 = vmul.f32 %v353_v30, %v95_v8 }
 0x182   :  { %130 = vrot.lane.b32.xlu0 %v124_v31, %s478_s4  ;;  %v117_v33 = vmul.f32 %v282_v26, %v109_v32  ;;  %v134_v42 = vmul.f32 %v126_v37, %v124_v31 }
 0x184   :  { %v125_v34 = vadd.f32 %v283_v28, %v117_v33 }
 0x186   :  { %132 = vrot.lane.b32.xlu1 %v125_v34, %s478_s4  ;;  %v135_v43 = vmul.f32 %v127_v38, %v125_v34 }
 0x1f4   :  { %v131_v36 = vpop.permute.xlu0 %130 }
 0x1f5   :  { %v136_v40 = vmul.f32 %v131_v36, %v128_v35 }
 0x1f7   :  { %v138_v45 = vadd.f32 %v136_v40, %v134_v42 }
 0x1f8   :  { %v133_v41 = vpop.permute.xlu1 %132 }
 0x1f9   :  { %v137_v44 = vmul.f32 %v133_v41, %v129_v39 }
 0x1fb   :  { %v139_v46 = vadd.f32 %v137_v44, %v135_v43 }
 0x1fd   :  { %v140_v47 = vpack.c.bf16 %v139_v46, %v138_v45 }
 0x1ff   :  { %328 = vmatmul.mubr.bf16.vlgmr.msra.gmra.mrb[0].mxu0 %v140_v47 }
 0x2d2   :  { %v246_v49 = vpop.f32.mrb[0].mxu0 }
 0x2d3   :  { %v329_v50 = vpop.f32.mrb[1].mxu0  ;;  %v247_v52 = vadd.f32 %v284_v48, %v246_v49 }
 0x2d4   :  { %v249_v51 = vpop.f32.mrb[2].mxu0 }
 0x2d5   :  { %v250_v53 = vadd.f32 %v284_v48, %v249_v51  ;;  %v330_v54 = vpop.f32.mrb[3].mxu0 }
 0x2d7   :  { %v300_v55 = vpack.c.bf16 %v250_v53, %v247_v52 }
 0x2d9   :  { %301 = vst [vmem:[#allocation10] sm:$0xff] %v300_v55  }
 0x2da   :  { %453 = shalt.err (!%p450_p8)
}
 0x2db   :  { %s454_s11 = scalar_lea.hbm %s630_s7, 128 }
 0x2dc   :  { %p455_p9 = scmp.ne.s32.totalorder %s630_s7, %s454_s11  ;;  %p458_p10 = scmp.lt.u32.totalorder %s454_s11, %s630_s7 }
 0x2de   :  { %p460_p11 = pnand %p458_p10, %p455_p9 }
 0x2e0   :  { %463 = shalt.err (!%p460_p11)
}
 0x2e1   :  { %274 = dma.vmem_to_hbm [thread:$0]  %s269_s8, 128, %s630_s7, [#allocation4], %s478_s4, %s478_s4, %s479_s13  }
 0x2e2   :  { %470 = dma.done.wait [#allocation4], 128  }
 0x2e3   :  { %471 = vsyncadd [#allocation4], 4294967168 }
 0x2e4   :  { %278 = vsyncpa [#allocation3], 1 }
 0x2e5   :  { %279 = vsyncpa [#allocation6], 1 }
 0x2e6   :  { %280 = vsyncpa [#allocation9], 1 }
 0x2e7   :  { %281 = vsyncpa [#allocation4], 1 }

</bundles_post_ra>
